<compile_context>
chip_gen: v7x
topology: tpu7x:2x2x1
jax: 0.10.0
libtpu: 0.0.40
codegen_flags: <defaults>
</compile_context>

<pallas_src>
from functools import partial

import numpy as np
import jax
import jax.numpy as jnp
from jax import lax
from jax.experimental import pallas as pl
from jax.experimental.pallas import tpu as pltpu


# ----------------------------------------------------------------------------
# Deterministic parameter initialization (NumPy re-implementation of the
# PyTorch sparse-init helpers; no torch / file loading).
# ----------------------------------------------------------------------------
def sparse_tensor_init(M, N, C, rng):
    """M x N matrix, each row has C nonzeros uniform in [-2, 2]."""
    W = np.zeros((M, N), dtype=np.float32)
    for i in range(M):
        idx = rng.choice(N, size=C, replace=False)
        vals = 2.0 * (2.0 * rng.rand(C).astype(np.float32) - 1.0)
        W[i, idx] = vals
    return W


def sparse_recurrent_tensor_init(M, C, rng):
    """M x M matrix, each column has C nonzeros uniform in [-2, 2]."""
    W = np.zeros((M, M), dtype=np.float32)
    for i in range(M):
        idx = rng.choice(M, size=C, replace=False)
        vals = 2.0 * (2.0 * rng.rand(C).astype(np.float32) - 1.0)
        W[idx, i] = vals
    return W


def sparse_eye_init(M):
    return np.eye(M, dtype=np.float32)


def spectral_norm_scaling(W, rho_desired):
    e = np.linalg.eigvals(W)
    rho_curr = np.max(np.abs(e))
    return (W * (rho_desired / rho_curr)).astype(np.float32)


def init_reservoir_params(input_size, units, input_scaling=1.0,
                          spectral_radius=0.99, leaky=1.0,
                          connectivity_input=10, connectivity_recurrent=10,
                          seed=0):
    rng = np.random.RandomState(seed)
    kernel = sparse_tensor_init(input_size, units, connectivity_input, rng)
    kernel = kernel * input_scaling
    W = sparse_recurrent_tensor_init(units, connectivity_recurrent, rng)
    if leaky == 1:
        W = spectral_norm_scaling(W, spectral_radius)
        recurrent_kernel = W
    else:
        I = sparse_eye_init(units)
        W = W * leaky + I * (1.0 - leaky)
        W = spectral_norm_scaling(W, spectral_radius)
        recurrent_kernel = (W + I * (leaky - 1.0)) * (1.0 / leaky)
    bias = (rng.rand(units).astype(np.float32) * 2.0 - 1.0) * input_scaling
    return (jnp.asarray(kernel, jnp.float32),
            jnp.asarray(recurrent_kernel, jnp.float32),
            jnp.asarray(bias, jnp.float32).reshape(1, units))


# ----------------------------------------------------------------------------
# Helpers
# ----------------------------------------------------------------------------
def _vmem_limit_bytes():
    """~3/4 of physical VMEM: ~96 MiB on v5e/v6e (128 MiB), ~48 MiB on v7x (64 MiB)."""
    cap = None
    try:
        cap = getattr(pltpu.get_tpu_info(), "vmem_capacity_bytes", None)
    except Exception:
        cap = None
    if not cap:
        cap = 64 * 1024 * 1024  # conservative default (v7x per-TC VMEM)
    return int(cap) * 3 // 4


def _resident_spec(block_shape, index_map):
    """Constant-index resident operand: single buffer (no double-buffer waste)."""
    try:
        return pl.BlockSpec(block_shape, index_map, pipeline_mode=pl.Buffered(1))
    except Exception:  # older jax without pipeline_mode -> default buffering
        return pl.BlockSpec(block_shape, index_map)


# ----------------------------------------------------------------------------
# Pallas kernel: one grid step = one (batch chunk, time chunk)
# ----------------------------------------------------------------------------
def _rollout_kernel(leaky_ref, h0_ref, k_ref, b_ref, w_ref, x_ref,
                    h_out_ref, h_scratch, *, steps_per_chunk):
    t_chunk = pl.program_id(1)

    @pl.when(t_chunk == 0)
    def _():
        # New batch chunk: (re)load the initial hidden state into the carry.
        h_scratch[...] = h0_ref[...]

    leaky = leaky_ref[0]  # runtime SMEM scalar

    def step(i, h):
        # Fused input projection: x_t @ K + bias (K resident in VMEM).
        x_t = x_ref[i]                                        # (BB, input_size)
        u = jnp.dot(x_t, k_ref[...],
                    preferred_element_type=jnp.float32) + b_ref[...]
        # Recurrent part: h_{t-1} @ W_rec (W resident in VMEM), f32 accumulate.
        s = jnp.dot(h.astype(w_ref.dtype), w_ref[...],
                    preferred_element_type=jnp.float32)
        out = jnp.tanh(u + s)                                 # f32
        h_new = h * (1.0 - leaky) + out * leaky               # f32 carry
        h_out_ref[i] = h_new.astype(h_out_ref.dtype)
        return h_new

    h_final = lax.fori_loop(0, steps_per_chunk, step, h_scratch[...],
                            unroll=True)
    h_scratch[...] = h_final


# ----------------------------------------------------------------------------
# Wrappers
# ----------------------------------------------------------------------------
@partial(jax.jit, static_argnames=("time_chunk", "batch_chunk", "param_dtype"))
def reservoir_rollout(xs, h0, kernel, recurrent_kernel, bias, leaky,
                      time_chunk=32, batch_chunk=256,
                      param_dtype=jnp.bfloat16):
    """Fused ESN rollout.

    xs: (T, B, input_size), h0: (B, units)  ->  hs: (T, B, units) float32
    Each step applies exactly the PyTorch ReservoirCell.forward math (default
    args). `leaky` is a runtime scalar (SMEM input), not a compile-time const.
    Weights / streamed x use `param_dtype` (bf16 by default) on the MXU; the
    hidden-state carry, accumulation and tanh stay in float32.
    """
    T, B, input_size = xs.shape
    units = h0.shape[1]

    # ---- batch chunking: leading "parallel" grid axis (megacore on v7x) ----
    BB = B
    if B > batch_chunk:
        for cand in range(min(B, batch_chunk), 7, -1):
            if B % cand == 0 and cand % 8 == 0:
                BB = cand
                break
    n_b = B // BB

    # ---- time chunking: amortize per-grid-step overhead, bigger DMA slabs ----
    tt_target = max(1, min(time_chunk, T))
    n_t = pl.cdiv(T, tt_target)
    TT = pl.cdiv(T, n_t)
    T_pad = n_t * TT
    if T_pad != T:
        xs = jnp.pad(xs, ((0, T_pad - T), (0, 0), (0, 0)))

    # ---- dtype plumbing: bf16 operands, f32 carry / bias / accumulation ----
    xs_c = xs.astype(param_dtype)
    k_c = kernel.astype(param_dtype)
    w_c = recurrent_kernel.astype(param_dtype)
    b_c = bias.astype(jnp.float32).reshape(1, units)
    h0_c = h0.astype(jnp.float32)
    leaky_arr = jnp.asarray(leaky, jnp.float32).reshape(1)

    kern = partial(_rollout_kernel, steps_per_chunk=TT)

    hs = pl.pallas_call(
        kern,
        out_shape=jax.ShapeDtypeStruct((T_pad, B, units), jnp.float32),
        grid=(n_b, n_t),
        in_specs=[
            # leaky scalar in SMEM (whole array, no tiling)
            pl.BlockSpec(memory_space=pltpu.MemorySpace.SMEM),
            # h0: one (BB, units) slab per batch chunk
            pl.BlockSpec((BB, units), lambda b, t: (b, 0)),
            # input kernel K: resident, single-buffered
            _resident_spec((input_size, units), lambda b, t: (0, 0)),
            # bias: resident, single-buffered
            _resident_spec((1, units), lambda b, t: (0, 0)),
            # W_rec: resident, single-buffered (dominant VMEM term)
            _resident_spec((units, units), lambda b, t: (0, 0)),
            # x: one (TT, BB, input_size) slab streamed per time chunk
            pl.BlockSpec((TT, BB, input_size), lambda b, t: (t, b, 0)),
        ],
        out_specs=pl.BlockSpec((TT, BB, units), lambda b, t: (t, b, 0)),
        scratch_shapes=[pltpu.VMEM((BB, units), jnp.float32)],
        compiler_params=pltpu.CompilerParams(
            dimension_semantics=("parallel", "arbitrary"),
            vmem_limit_bytes=_vmem_limit_bytes()),
    )(leaky_arr, h0_c, k_c, b_c, w_c, xs_c)

    return hs[:T] if T_pad != T else hs


def reservoir_cell_forward(xt, h_prev, kernel, recurrent_kernel, bias,
                           leaky=1.0, param_dtype=jnp.float32):
    """Single-step forward matching the PyTorch module: returns (h_t, h_t)."""
    hs = reservoir_rollout(xt[None], h_prev, kernel, recurrent_kernel, bias,
                           leaky, param_dtype=param_dtype)
    h_t = hs[0]
    return h_t, h_t


# ----------------------------------------------------------------------------
# Main
# ----------------------------------------------------------------------------
if __name__ == "__main__":
    T = 8           # timesteps
    B = 8           # batch
    INPUT_SIZE = 16
    UNITS = 128
    INPUT_SCALING = 1.0
    SPECTRAL_RADIUS = 0.99
    LEAKY = 1.0
    CONN_IN = 10
    CONN_REC = 10

    kernel, recurrent_kernel, bias = init_reservoir_params(
        INPUT_SIZE, UNITS,
        input_scaling=INPUT_SCALING,
        spectral_radius=SPECTRAL_RADIUS,
        leaky=LEAKY,
        connectivity_input=CONN_IN,
        connectivity_recurrent=CONN_REC,
        seed=0,
    )

    key = jax.random.PRNGKey(0)
    kx, kh = jax.random.split(key)
    xs = jax.random.normal(kx, (T, B, INPUT_SIZE), dtype=jnp.float32)
    h0 = jax.random.normal(kh, (B, UNITS), dtype=jnp.float32)

    # Plain-JAX reference rollout (same math as the torch forward, default args),
    # parameterized by the matmul-operand dtype (f32 carry / accumulation).
    def ref_rollout(xs, h0, K, W, b, leaky, dtype):
        Kc, Wc, xc = K.astype(dtype), W.astype(dtype), xs.astype(dtype)
        h = h0.astype(jnp.float32)
        outs = []
        for t in range(xs.shape[0]):
            u = jnp.dot(xc[t], Kc, preferred_element_type=jnp.float32) + b
            s = jnp.dot(h.astype(dtype), Wc, preferred_element_type=jnp.float32)
            o = jnp.tanh(u + s)
            h = h * (1.0 - leaky) + o * leaky
            outs.append(h)
        return jnp.stack(outs)

    # 1) Fused rollout in pure f32 (param_dtype=f32), tight tolerance.
    hs32 = jax.block_until_ready(
        reservoir_rollout(xs, h0, kernel, recurrent_kernel, bias, LEAKY,
                          param_dtype=jnp.float32))
    ref32 = ref_rollout(xs, h0, kernel, recurrent_kernel, bias, LEAKY,
                        jnp.float32)
    np.testing.assert_allclose(np.asarray(hs32), np.asarray(ref32),
                               rtol=1e-4, atol=1e-4)

    # 2) Default bf16-weight path (f32 carry), vs bf16-weight JAX reference.
    hsbf = jax.block_until_ready(
        reservoir_rollout(xs, h0, kernel, recurrent_kernel, bias, LEAKY))
    refbf = ref_rollout(xs, h0, kernel, recurrent_kernel, bias, LEAKY,
                        jnp.bfloat16)
    np.testing.assert_allclose(np.asarray(hsbf), np.asarray(refbf),
                               rtol=2e-2, atol=2e-2)

    # 3) Different leaky through the SAME jitted executable (runtime SMEM scalar).
    hs_l = jax.block_until_ready(
        reservoir_rollout(xs, h0, kernel, recurrent_kernel, bias, 0.5))
    ref_l = ref_rollout(xs, h0, kernel, recurrent_kernel, bias, 0.5,
                        jnp.bfloat16)
    np.testing.assert_allclose(np.asarray(hs_l), np.asarray(ref_l),
                               rtol=2e-2, atol=2e-2)

    # 4) Single-step module forward.
    h1, h1_dup = reservoir_cell_forward(xs[0], h0, kernel, recurrent_kernel,
                                        bias, LEAKY)
    h1 = jax.block_until_ready(h1)
    ref1 = jnp.tanh(xs[0] @ kernel + bias + h0 @ recurrent_kernel)
    ref1 = h0 * (1.0 - LEAKY) + ref1 * LEAKY
    np.testing.assert_allclose(np.asarray(h1), np.asarray(ref1),
                               rtol=1e-4, atol=1e-4)

    # 5) T not divisible by the time chunk (exercises the padded-tail path).
    hs_tail = jax.block_until_ready(
        reservoir_rollout(xs[:5], h0, kernel, recurrent_kernel, bias, LEAKY,
                          time_chunk=4, param_dtype=jnp.float32))
    ref_tail = ref_rollout(xs[:5], h0, kernel, recurrent_kernel, bias, LEAKY,
                           jnp.float32)
    np.testing.assert_allclose(np.asarray(hs_tail), np.asarray(ref_tail),
                               rtol=1e-4, atol=1e-4)

    print("KERNEL_OK")
</pallas_src>

<mosaic_0001>
module attributes {stable_mosaic.version = 11 : i64} {
  func.func @_rollout_kernel(%arg0: i32, %arg1: i32, %arg2: memref<1xf32, #tpu.memory_space<smem>>, %arg3: memref<8x128xf32, #tpu.memory_space<vmem>>, %arg4: memref<16x128xf32, #tpu.memory_space<vmem>>, %arg5: memref<1x128xf32, #tpu.memory_space<vmem>>, %arg6: memref<128x128xf32, #tpu.memory_space<vmem>>, %arg7: memref<8x8x16xf32, #tpu.memory_space<vmem>>, %arg8: memref<8x8x128xf32, #tpu.memory_space<vmem>>, %arg9: memref<8x128xf32, #tpu.memory_space<vmem>>) attributes {dimension_semantics = [#tpu.dimension_semantics<parallel>, #tpu.dimension_semantics<arbitrary>], iteration_bounds = array<i64: 1, 1>, scalar_prefetch = 0 : i64, scratch_operands = 1 : i64, tpu.core_type = #tpu.core_type<tc>, window_params = [{transform_indices = @transform_0, window_bounds = array<i64: 1>}, {transform_indices = @transform_1, window_bounds = array<i64: 8, 128>}, {pipeline_mode = #tpu.pipeline_mode<synchronous>, transform_indices = @transform_2, window_bounds = array<i64: 16, 128>}, {pipeline_mode = #tpu.pipeline_mode<synchronous>, transform_indices = @transform_3, window_bounds = array<i64: 1, 128>}, {pipeline_mode = #tpu.pipeline_mode<synchronous>, transform_indices = @transform_4, window_bounds = array<i64: 128, 128>}, {transform_indices = @transform_5, window_bounds = array<i64: 8, 8, 16>}, {transform_indices = @transform_6, window_bounds = array<i64: 8, 8, 128>}]} {
    %c0_i32 = arith.constant 0 : i32
    %0 = arith.cmpi eq, %arg1, %c0_i32 : i32
    %1 = arith.extui %0 : i1 to i32
    %c0_i32_0 = arith.constant 0 : i32
    %2 = arith.cmpi ne, %1, %c0_i32_0 : i32
    scf.if %2 {
      %c0_109 = arith.constant 0 : index
      %c0_110 = arith.constant 0 : index
      %182 = vector.load %arg3[%c0_109, %c0_110] : memref<8x128xf32, #tpu.memory_space<vmem>>, vector<8x128xf32>
      %c0_111 = arith.constant 0 : index
      %c0_112 = arith.constant 0 : index
      %183 = vector.load %arg9[%c0_111, %c0_112] : memref<8x128xf32, #tpu.memory_space<vmem>>, vector<8x128xf32>
      tpu.vector_store %arg9[%c0_111, %c0_112], %182 {strides = array<i32>} : memref<8x128xf32, #tpu.memory_space<vmem>>, vector<8x128xf32>,
    } else {
    }
    %c0 = arith.constant 0 : index
    %3 = memref.load %arg2[%c0] : memref<1xf32, #tpu.memory_space<smem>>
    %c0_1 = arith.constant 0 : index
    %c0_2 = arith.constant 0 : index
    %4 = vector.load %arg9[%c0_1, %c0_2] : memref<8x128xf32, #tpu.memory_space<vmem>>, vector<8x128xf32>
    %c0_i32_3 = arith.constant 0 : i32
    %5 = arith.index_cast %c0_i32_3 : i32 to index
    %c0_4 = arith.constant 0 : index
    %c0_5 = arith.constant 0 : index
    %6 = vector.load %arg7[%5, %c0_4, %c0_5] : memref<8x8x16xf32, #tpu.memory_space<vmem>>, vector<1x8x16xf32>
    %7 = vector.shape_cast %6 : vector<1x8x16xf32> to vector<8x16xf32>
    %c0_6 = arith.constant 0 : index
    %c0_7 = arith.constant 0 : index
    %8 = vector.load %arg4[%c0_6, %c0_7] : memref<16x128xf32, #tpu.memory_space<vmem>>, vector<16x128xf32>
    %cst = arith.constant dense<0.000000e+00> : vector<8x128xf32>
    %9 = tpu.matmul %7, %8, %cst {dimension_numbers = #tpu.dot_dimension_numbers<[1], [0], [0], [1], [0, 0, 1, 1], [], []>} : vector<8x16xf32>, vector<16x128xf32>, vector<8x128xf32> -> vector<8x128xf32>
    %c0_8 = arith.constant 0 : index
    %c0_9 = arith.constant 0 : index
    %10 = vector.load %arg5[%c0_8, %c0_9] : memref<1x128xf32, #tpu.memory_space<vmem>>, vector<1x128xf32>
    %11 = vector.broadcast %10 : vector<1x128xf32> to vector<8x128xf32>
    %12 = arith.addf %9, %11 : vector<8x128xf32>
    %c0_10 = arith.constant 0 : index
    %c0_11 = arith.constant 0 : index
    %13 = vector.load %arg6[%c0_10, %c0_11] : memref<128x128xf32, #tpu.memory_space<vmem>>, vector<128x128xf32>
    %cst_12 = arith.constant dense<0.000000e+00> : vector<8x128xf32>
    %14 = tpu.matmul %4, %13, %cst_12 {dimension_numbers = #tpu.dot_dimension_numbers<[1], [0], [0], [1], [0, 0, 1, 1], [], []>} : vector<8x128xf32>, vector<128x128xf32>, vector<8x128xf32> -> vector<8x128xf32>
    %15 = arith.addf %12, %14 : vector<8x128xf32>
    %16 = math.tanh %15 : vector<8x128xf32>
    %cst_13 = arith.constant 1.000000e+00 : f32
    %17 = arith.subf %cst_13, %3 : f32
    %18 = vector.broadcast %17 : f32 to vector<8x128xf32>
    %19 = arith.mulf %4, %18 : vector<8x128xf32>
    %20 = vector.broadcast %3 : f32 to vector<8x128xf32>
    %21 = arith.mulf %16, %20 : vector<8x128xf32>
    %22 = arith.addf %19, %21 : vector<8x128xf32>
    %23 = arith.index_cast %c0_i32_3 : i32 to index
    %c0_14 = arith.constant 0 : index
    %c0_15 = arith.constant 0 : index
    %24 = vector.load %arg8[%23, %c0_14, %c0_15] : memref<8x8x128xf32, #tpu.memory_space<vmem>>, vector<1x8x128xf32>
    %25 = vector.shape_cast %24 : vector<1x8x128xf32> to vector<8x128xf32>
    %26 = vector.shape_cast %22 : vector<8x128xf32> to vector<1x8x128xf32>
    tpu.vector_store %arg8[%23, %c0_14, %c0_15], %26 {strides = array<i32>} : memref<8x8x128xf32, #tpu.memory_space<vmem>>, vector<1x8x128xf32>,
    %c1_i32 = arith.constant 1 : i32
    %27 = arith.index_cast %c1_i32 : i32 to index
    %c0_16 = arith.constant 0 : index
    %c0_17 = arith.constant 0 : index
    %28 = vector.load %arg7[%27, %c0_16, %c0_17] : memref<8x8x16xf32, #tpu.memory_space<vmem>>, vector<1x8x16xf32>
    %29 = vector.shape_cast %28 : vector<1x8x16xf32> to vector<8x16xf32>
    %c0_18 = arith.constant 0 : index
    %c0_19 = arith.constant 0 : index
    %30 = vector.load %arg4[%c0_18, %c0_19] : memref<16x128xf32, #tpu.memory_space<vmem>>, vector<16x128xf32>
    %cst_20 = arith.constant dense<0.000000e+00> : vector<8x128xf32>
    %31 = tpu.matmul %29, %30, %cst_20 {dimension_numbers = #tpu.dot_dimension_numbers<[1], [0], [0], [1], [0, 0, 1, 1], [], []>} : vector<8x16xf32>, vector<16x128xf32>, vector<8x128xf32> -> vector<8x128xf32>
    %c0_21 = arith.constant 0 : index
    %c0_22 = arith.constant 0 : index
    %32 = vector.load %arg5[%c0_21, %c0_22] : memref<1x128xf32, #tpu.memory_space<vmem>>, vector<1x128xf32>
    %33 = vector.broadcast %32 : vector<1x128xf32> to vector<8x128xf32>
    %34 = arith.addf %31, %33 : vector<8x128xf32>
    %c0_23 = arith.constant 0 : index
    %c0_24 = arith.constant 0 : index
    %35 = vector.load %arg6[%c0_23, %c0_24] : memref<128x128xf32, #tpu.memory_space<vmem>>, vector<128x128xf32>
    %cst_25 = arith.constant dense<0.000000e+00> : vector<8x128xf32>
    %36 = tpu.matmul %22, %35, %cst_25 {dimension_numbers = #tpu.dot_dimension_numbers<[1], [0], [0], [1], [0, 0, 1, 1], [], []>} : vector<8x128xf32>, vector<128x128xf32>, vector<8x128xf32> -> vector<8x128xf32>
    %37 = arith.addf %34, %36 : vector<8x128xf32>
    %38 = math.tanh %37 : vector<8x128xf32>
    %cst_26 = arith.constant 1.000000e+00 : f32
    %39 = arith.subf %cst_26, %3 : f32
    %40 = vector.broadcast %39 : f32 to vector<8x128xf32>
    %41 = arith.mulf %22, %40 : vector<8x128xf32>
    %42 = vector.broadcast %3 : f32 to vector<8x128xf32>
    %43 = arith.mulf %38, %42 : vector<8x128xf32>
    %44 = arith.addf %41, %43 : vector<8x128xf32>
    %45 = arith.index_cast %c1_i32 : i32 to index
    %c0_27 = arith.constant 0 : index
    %c0_28 = arith.constant 0 : index
    %46 = vector.load %arg8[%45, %c0_27, %c0_28] : memref<8x8x128xf32, #tpu.memory_space<vmem>>, vector<1x8x128xf32>
    %47 = vector.shape_cast %46 : vector<1x8x128xf32> to vector<8x128xf32>
    %48 = vector.shape_cast %44 : vector<8x128xf32> to vector<1x8x128xf32>
    tpu.vector_store %arg8[%45, %c0_27, %c0_28], %48 {strides = array<i32>} : memref<8x8x128xf32, #tpu.memory_space<vmem>>, vector<1x8x128xf32>,
    %c2_i32 = arith.constant 2 : i32
    %49 = arith.index_cast %c2_i32 : i32 to index
    %c0_29 = arith.constant 0 : index
    %c0_30 = arith.constant 0 : index
    %50 = vector.load %arg7[%49, %c0_29, %c0_30] : memref<8x8x16xf32, #tpu.memory_space<vmem>>, vector<1x8x16xf32>
    %51 = vector.shape_cast %50 : vector<1x8x16xf32> to vector<8x16xf32>
    %c0_31 = arith.constant 0 : index
    %c0_32 = arith.constant 0 : index
    %52 = vector.load %arg4[%c0_31, %c0_32] : memref<16x128xf32, #tpu.memory_space<vmem>>, vector<16x128xf32>
    %cst_33 = arith.constant dense<0.000000e+00> : vector<8x128xf32>
    %53 = tpu.matmul %51, %52, %cst_33 {dimension_numbers = #tpu.dot_dimension_numbers<[1], [0], [0], [1], [0, 0, 1, 1], [], []>} : vector<8x16xf32>, vector<16x128xf32>, vector<8x128xf32> -> vector<8x128xf32>
    %c0_34 = arith.constant 0 : index
    %c0_35 = arith.constant 0 : index
    %54 = vector.load %arg5[%c0_34, %c0_35] : memref<1x128xf32, #tpu.memory_space<vmem>>, vector<1x128xf32>
    %55 = vector.broadcast %54 : vector<1x128xf32> to vector<8x128xf32>
    %56 = arith.addf %53, %55 : vector<8x128xf32>
    %c0_36 = arith.constant 0 : index
    %c0_37 = arith.constant 0 : index
    %57 = vector.load %arg6[%c0_36, %c0_37] : memref<128x128xf32, #tpu.memory_space<vmem>>, vector<128x128xf32>
    %cst_38 = arith.constant dense<0.000000e+00> : vector<8x128xf32>
    %58 = tpu.matmul %44, %57, %cst_38 {dimension_numbers = #tpu.dot_dimension_numbers<[1], [0], [0], [1], [0, 0, 1, 1], [], []>} : vector<8x128xf32>, vector<128x128xf32>, vector<8x128xf32> -> vector<8x128xf32>
    %59 = arith.addf %56, %58 : vector<8x128xf32>
    %60 = math.tanh %59 : vector<8x128xf32>
    %cst_39 = arith.constant 1.000000e+00 : f32
    %61 = arith.subf %cst_39, %3 : f32
    %62 = vector.broadcast %61 : f32 to vector<8x128xf32>
    %63 = arith.mulf %44, %62 : vector<8x128xf32>
    %64 = vector.broadcast %3 : f32 to vector<8x128xf32>
    %65 = arith.mulf %60, %64 : vector<8x128xf32>
    %66 = arith.addf %63, %65 : vector<8x128xf32>
    %67 = arith.index_cast %c2_i32 : i32 to index
    %c0_40 = arith.constant 0 : index
    %c0_41 = arith.constant 0 : index
    %68 = vector.load %arg8[%67, %c0_40, %c0_41] : memref<8x8x128xf32, #tpu.memory_space<vmem>>, vector<1x8x128xf32>
    %69 = vector.shape_cast %68 : vector<1x8x128xf32> to vector<8x128xf32>
    %70 = vector.shape_cast %66 : vector<8x128xf32> to vector<1x8x128xf32>
    tpu.vector_store %arg8[%67, %c0_40, %c0_41], %70 {strides = array<i32>} : memref<8x8x128xf32, #tpu.memory_space<vmem>>, vector<1x8x128xf32>,
    %c3_i32 = arith.constant 3 : i32
    %71 = arith.index_cast %c3_i32 : i32 to index
    %c0_42 = arith.constant 0 : index
    %c0_43 = arith.constant 0 : index
    %72 = vector.load %arg7[%71, %c0_42, %c0_43] : memref<8x8x16xf32, #tpu.memory_space<vmem>>, vector<1x8x16xf32>
    %73 = vector.shape_cast %72 : vector<1x8x16xf32> to vector<8x16xf32>
    %c0_44 = arith.constant 0 : index
    %c0_45 = arith.constant 0 : index
    %74 = vector.load %arg4[%c0_44, %c0_45] : memref<16x128xf32, #tpu.memory_space<vmem>>, vector<16x128xf32>
    %cst_46 = arith.constant dense<0.000000e+00> : vector<8x128xf32>
    %75 = tpu.matmul %73, %74, %cst_46 {dimension_numbers = #tpu.dot_dimension_numbers<[1], [0], [0], [1], [0, 0, 1, 1], [], []>} : vector<8x16xf32>, vector<16x128xf32>, vector<8x128xf32> -> vector<8x128xf32>
    %c0_47 = arith.constant 0 : index
    %c0_48 = arith.constant 0 : index
    %76 = vector.load %arg5[%c0_47, %c0_48] : memref<1x128xf32, #tpu.memory_space<vmem>>, vector<1x128xf32>
    %77 = vector.broadcast %76 : vector<1x128xf32> to vector<8x128xf32>
    %78 = arith.addf %75, %77 : vector<8x128xf32>
    %c0_49 = arith.constant 0 : index
    %c0_50 = arith.constant 0 : index
    %79 = vector.load %arg6[%c0_49, %c0_50] : memref<128x128xf32, #tpu.memory_space<vmem>>, vector<128x128xf32>
    %cst_51 = arith.constant dense<0.000000e+00> : vector<8x128xf32>
    %80 = tpu.matmul %66, %79, %cst_51 {dimension_numbers = #tpu.dot_dimension_numbers<[1], [0], [0], [1], [0, 0, 1, 1], [], []>} : vector<8x128xf32>, vector<128x128xf32>, vector<8x128xf32> -> vector<8x128xf32>
    %81 = arith.addf %78, %80 : vector<8x128xf32>
    %82 = math.tanh %81 : vector<8x128xf32>
    %cst_52 = arith.constant 1.000000e+00 : f32
    %83 = arith.subf %cst_52, %3 : f32
    %84 = vector.broadcast %83 : f32 to vector<8x128xf32>
    %85 = arith.mulf %66, %84 : vector<8x128xf32>
    %86 = vector.broadcast %3 : f32 to vector<8x128xf32>
    %87 = arith.mulf %82, %86 : vector<8x128xf32>
    %88 = arith.addf %85, %87 : vector<8x128xf32>
    %89 = arith.index_cast %c3_i32 : i32 to index
    %c0_53 = arith.constant 0 : index
    %c0_54 = arith.constant 0 : index
    %90 = vector.load %arg8[%89, %c0_53, %c0_54] : memref<8x8x128xf32, #tpu.memory_space<vmem>>, vector<1x8x128xf32>
    %91 = vector.shape_cast %90 : vector<1x8x128xf32> to vector<8x128xf32>
    %92 = vector.shape_cast %88 : vector<8x128xf32> to vector<1x8x128xf32>
    tpu.vector_store %arg8[%89, %c0_53, %c0_54], %92 {strides = array<i32>} : memref<8x8x128xf32, #tpu.memory_space<vmem>>, vector<1x8x128xf32>,
    %c4_i32 = arith.constant 4 : i32
    %93 = arith.index_cast %c4_i32 : i32 to index
    %c0_55 = arith.constant 0 : index
    %c0_56 = arith.constant 0 : index
    %94 = vector.load %arg7[%93, %c0_55, %c0_56] : memref<8x8x16xf32, #tpu.memory_space<vmem>>, vector<1x8x16xf32>
    %95 = vector.shape_cast %94 : vector<1x8x16xf32> to vector<8x16xf32>
    %c0_57 = arith.constant 0 : index
    %c0_58 = arith.constant 0 : index
    %96 = vector.load %arg4[%c0_57, %c0_58] : memref<16x128xf32, #tpu.memory_space<vmem>>, vector<16x128xf32>
    %cst_59 = arith.constant dense<0.000000e+00> : vector<8x128xf32>
    %97 = tpu.matmul %95, %96, %cst_59 {dimension_numbers = #tpu.dot_dimension_numbers<[1], [0], [0], [1], [0, 0, 1, 1], [], []>} : vector<8x16xf32>, vector<16x128xf32>, vector<8x128xf32> -> vector<8x128xf32>
    %c0_60 = arith.constant 0 : index
    %c0_61 = arith.constant 0 : index
    %98 = vector.load %arg5[%c0_60, %c0_61] : memref<1x128xf32, #tpu.memory_space<vmem>>, vector<1x128xf32>
    %99 = vector.broadcast %98 : vector<1x128xf32> to vector<8x128xf32>
    %100 = arith.addf %97, %99 : vector<8x128xf32>
    %c0_62 = arith.constant 0 : index
    %c0_63 = arith.constant 0 : index
    %101 = vector.load %arg6[%c0_62, %c0_63] : memref<128x128xf32, #tpu.memory_space<vmem>>, vector<128x128xf32>
    %cst_64 = arith.constant dense<0.000000e+00> : vector<8x128xf32>
    %102 = tpu.matmul %88, %101, %cst_64 {dimension_numbers = #tpu.dot_dimension_numbers<[1], [0], [0], [1], [0, 0, 1, 1], [], []>} : vector<8x128xf32>, vector<128x128xf32>, vector<8x128xf32> -> vector<8x128xf32>
    %103 = arith.addf %100, %102 : vector<8x128xf32>
    %104 = math.tanh %103 : vector<8x128xf32>
    %cst_65 = arith.constant 1.000000e+00 : f32
    %105 = arith.subf %cst_65, %3 : f32
    %106 = vector.broadcast %105 : f32 to vector<8x128xf32>
    %107 = arith.mulf %88, %106 : vector<8x128xf32>
    %108 = vector.broadcast %3 : f32 to vector<8x128xf32>
    %109 = arith.mulf %104, %108 : vector<8x128xf32>
    %110 = arith.addf %107, %109 : vector<8x128xf32>
    %111 = arith.index_cast %c4_i32 : i32 to index
    %c0_66 = arith.constant 0 : index
    %c0_67 = arith.constant 0 : index
    %112 = vector.load %arg8[%111, %c0_66, %c0_67] : memref<8x8x128xf32, #tpu.memory_space<vmem>>, vector<1x8x128xf32>
    %113 = vector.shape_cast %112 : vector<1x8x128xf32> to vector<8x128xf32>
    %114 = vector.shape_cast %110 : vector<8x128xf32> to vector<1x8x128xf32>
    tpu.vector_store %arg8[%111, %c0_66, %c0_67], %114 {strides = array<i32>} : memref<8x8x128xf32, #tpu.memory_space<vmem>>, vector<1x8x128xf32>,
    %c5_i32 = arith.constant 5 : i32
    %115 = arith.index_cast %c5_i32 : i32 to index
    %c0_68 = arith.constant 0 : index
    %c0_69 = arith.constant 0 : index
    %116 = vector.load %arg7[%115, %c0_68, %c0_69] : memref<8x8x16xf32, #tpu.memory_space<vmem>>, vector<1x8x16xf32>
    %117 = vector.shape_cast %116 : vector<1x8x16xf32> to vector<8x16xf32>
    %c0_70 = arith.constant 0 : index
    %c0_71 = arith.constant 0 : index
    %118 = vector.load %arg4[%c0_70, %c0_71] : memref<16x128xf32, #tpu.memory_space<vmem>>, vector<16x128xf32>
    %cst_72 = arith.constant dense<0.000000e+00> : vector<8x128xf32>
    %119 = tpu.matmul %117, %118, %cst_72 {dimension_numbers = #tpu.dot_dimension_numbers<[1], [0], [0], [1], [0, 0, 1, 1], [], []>} : vector<8x16xf32>, vector<16x128xf32>, vector<8x128xf32> -> vector<8x128xf32>
    %c0_73 = arith.constant 0 : index
    %c0_74 = arith.constant 0 : index
    %120 = vector.load %arg5[%c0_73, %c0_74] : memref<1x128xf32, #tpu.memory_space<vmem>>, vector<1x128xf32>
    %121 = vector.broadcast %120 : vector<1x128xf32> to vector<8x128xf32>
    %122 = arith.addf %119, %121 : vector<8x128xf32>
    %c0_75 = arith.constant 0 : index
    %c0_76 = arith.constant 0 : index
    %123 = vector.load %arg6[%c0_75, %c0_76] : memref<128x128xf32, #tpu.memory_space<vmem>>, vector<128x128xf32>
    %cst_77 = arith.constant dense<0.000000e+00> : vector<8x128xf32>
    %124 = tpu.matmul %110, %123, %cst_77 {dimension_numbers = #tpu.dot_dimension_numbers<[1], [0], [0], [1], [0, 0, 1, 1], [], []>} : vector<8x128xf32>, vector<128x128xf32>, vector<8x128xf32> -> vector<8x128xf32>
    %125 = arith.addf %122, %124 : vector<8x128xf32>
    %126 = math.tanh %125 : vector<8x128xf32>
    %cst_78 = arith.constant 1.000000e+00 : f32
    %127 = arith.subf %cst_78, %3 : f32
    %128 = vector.broadcast %127 : f32 to vector<8x128xf32>
    %129 = arith.mulf %110, %128 : vector<8x128xf32>
    %130 = vector.broadcast %3 : f32 to vector<8x128xf32>
    %131 = arith.mulf %126, %130 : vector<8x128xf32>
    %132 = arith.addf %129, %131 : vector<8x128xf32>
    %133 = arith.index_cast %c5_i32 : i32 to index
    %c0_79 = arith.constant 0 : index
    %c0_80 = arith.constant 0 : index
    %134 = vector.load %arg8[%133, %c0_79, %c0_80] : memref<8x8x128xf32, #tpu.memory_space<vmem>>, vector<1x8x128xf32>
    %135 = vector.shape_cast %134 : vector<1x8x128xf32> to vector<8x128xf32>
    %136 = vector.shape_cast %132 : vector<8x128xf32> to vector<1x8x128xf32>
    tpu.vector_store %arg8[%133, %c0_79, %c0_80], %136 {strides = array<i32>} : memref<8x8x128xf32, #tpu.memory_space<vmem>>, vector<1x8x128xf32>,
    %c6_i32 = arith.constant 6 : i32
    %137 = arith.index_cast %c6_i32 : i32 to index
    %c0_81 = arith.constant 0 : index
    %c0_82 = arith.constant 0 : index
    %138 = vector.load %arg7[%137, %c0_81, %c0_82] : memref<8x8x16xf32, #tpu.memory_space<vmem>>, vector<1x8x16xf32>
    %139 = vector.shape_cast %138 : vector<1x8x16xf32> to vector<8x16xf32>
    %c0_83 = arith.constant 0 : index
    %c0_84 = arith.constant 0 : index
    %140 = vector.load %arg4[%c0_83, %c0_84] : memref<16x128xf32, #tpu.memory_space<vmem>>, vector<16x128xf32>
    %cst_85 = arith.constant dense<0.000000e+00> : vector<8x128xf32>
    %141 = tpu.matmul %139, %140, %cst_85 {dimension_numbers = #tpu.dot_dimension_numbers<[1], [0], [0], [1], [0, 0, 1, 1], [], []>} : vector<8x16xf32>, vector<16x128xf32>, vector<8x128xf32> -> vector<8x128xf32>
    %c0_86 = arith.constant 0 : index
    %c0_87 = arith.constant 0 : index
    %142 = vector.load %arg5[%c0_86, %c0_87] : memref<1x128xf32, #tpu.memory_space<vmem>>, vector<1x128xf32>
    %143 = vector.broadcast %142 : vector<1x128xf32> to vector<8x128xf32>
    %144 = arith.addf %141, %143 : vector<8x128xf32>
    %c0_88 = arith.constant 0 : index
    %c0_89 = arith.constant 0 : index
    %145 = vector.load %arg6[%c0_88, %c0_89] : memref<128x128xf32, #tpu.memory_space<vmem>>, vector<128x128xf32>
    %cst_90 = arith.constant dense<0.000000e+00> : vector<8x128xf32>
    %146 = tpu.matmul %132, %145, %cst_90 {dimension_numbers = #tpu.dot_dimension_numbers<[1], [0], [0], [1], [0, 0, 1, 1], [], []>} : vector<8x128xf32>, vector<128x128xf32>, vector<8x128xf32> -> vector<8x128xf32>
    %147 = arith.addf %144, %146 : vector<8x128xf32>
    %148 = math.tanh %147 : vector<8x128xf32>
    %cst_91 = arith.constant 1.000000e+00 : f32
    %149 = arith.subf %cst_91, %3 : f32
    %150 = vector.broadcast %149 : f32 to vector<8x128xf32>
    %151 = arith.mulf %132, %150 : vector<8x128xf32>
    %152 = vector.broadcast %3 : f32 to vector<8x128xf32>
    %153 = arith.mulf %148, %152 : vector<8x128xf32>
    %154 = arith.addf %151, %153 : vector<8x128xf32>
    %155 = arith.index_cast %c6_i32 : i32 to index
    %c0_92 = arith.constant 0 : index
    %c0_93 = arith.constant 0 : index
    %156 = vector.load %arg8[%155, %c0_92, %c0_93] : memref<8x8x128xf32, #tpu.memory_space<vmem>>, vector<1x8x128xf32>
    %157 = vector.shape_cast %156 : vector<1x8x128xf32> to vector<8x128xf32>
    %158 = vector.shape_cast %154 : vector<8x128xf32> to vector<1x8x128xf32>
    tpu.vector_store %arg8[%155, %c0_92, %c0_93], %158 {strides = array<i32>} : memref<8x8x128xf32, #tpu.memory_space<vmem>>, vector<1x8x128xf32>,
    %c7_i32 = arith.constant 7 : i32
    %159 = arith.index_cast %c7_i32 : i32 to index
    %c0_94 = arith.constant 0 : index
    %c0_95 = arith.constant 0 : index
    %160 = vector.load %arg7[%159, %c0_94, %c0_95] : memref<8x8x16xf32, #tpu.memory_space<vmem>>, vector<1x8x16xf32>
    %161 = vector.shape_cast %160 : vector<1x8x16xf32> to vector<8x16xf32>
    %c0_96 = arith.constant 0 : index
    %c0_97 = arith.constant 0 : index
    %162 = vector.load %arg4[%c0_96, %c0_97] : memref<16x128xf32, #tpu.memory_space<vmem>>, vector<16x128xf32>
    %cst_98 = arith.constant dense<0.000000e+00> : vector<8x128xf32>
    %163 = tpu.matmul %161, %162, %cst_98 {dimension_numbers = #tpu.dot_dimension_numbers<[1], [0], [0], [1], [0, 0, 1, 1], [], []>} : vector<8x16xf32>, vector<16x128xf32>, vector<8x128xf32> -> vector<8x128xf32>
    %c0_99 = arith.constant 0 : index
    %c0_100 = arith.constant 0 : index
    %164 = vector.load %arg5[%c0_99, %c0_100] : memref<1x128xf32, #tpu.memory_space<vmem>>, vector<1x128xf32>
    %165 = vector.broadcast %164 : vector<1x128xf32> to vector<8x128xf32>
    %166 = arith.addf %163, %165 : vector<8x128xf32>
    %c0_101 = arith.constant 0 : index
    %c0_102 = arith.constant 0 : index
    %167 = vector.load %arg6[%c0_101, %c0_102] : memref<128x128xf32, #tpu.memory_space<vmem>>, vector<128x128xf32>
    %cst_103 = arith.constant dense<0.000000e+00> : vector<8x128xf32>
    %168 = tpu.matmul %154, %167, %cst_103 {dimension_numbers = #tpu.dot_dimension_numbers<[1], [0], [0], [1], [0, 0, 1, 1], [], []>} : vector<8x128xf32>, vector<128x128xf32>, vector<8x128xf32> -> vector<8x128xf32>
    %169 = arith.addf %166, %168 : vector<8x128xf32>
    %170 = math.tanh %169 : vector<8x128xf32>
    %cst_104 = arith.constant 1.000000e+00 : f32
    %171 = arith.subf %cst_104, %3 : f32
    %172 = vector.broadcast %171 : f32 to vector<8x128xf32>
    %173 = arith.mulf %154, %172 : vector<8x128xf32>
    %174 = vector.broadcast %3 : f32 to vector<8x128xf32>
    %175 = arith.mulf %170, %174 : vector<8x128xf32>
    %176 = arith.addf %173, %175 : vector<8x128xf32>
    %177 = arith.index_cast %c7_i32 : i32 to index
    %c0_105 = arith.constant 0 : index
    %c0_106 = arith.constant 0 : index
    %178 = vector.load %arg8[%177, %c0_105, %c0_106] : memref<8x8x128xf32, #tpu.memory_space<vmem>>, vector<1x8x128xf32>
    %179 = vector.shape_cast %178 : vector<1x8x128xf32> to vector<8x128xf32>
    %180 = vector.shape_cast %176 : vector<8x128xf32> to vector<1x8x128xf32>
    tpu.vector_store %arg8[%177, %c0_105, %c0_106], %180 {strides = array<i32>} : memref<8x8x128xf32, #tpu.memory_space<vmem>>, vector<1x8x128xf32>,
    %c8_i32 = arith.constant 8 : i32
    %c0_107 = arith.constant 0 : index
    %c0_108 = arith.constant 0 : index
    %181 = vector.load %arg9[%c0_107, %c0_108] : memref<8x128xf32, #tpu.memory_space<vmem>>, vector<8x128xf32>
    tpu.vector_store %arg9[%c0_107, %c0_108], %176 {strides = array<i32>} : memref<8x128xf32, #tpu.memory_space<vmem>>, vector<8x128xf32>,
    return
  }
  func.func @transform_0(%arg0: i32, %arg1: i32) -> i32 {
    %c0_i32 = arith.constant 0 : i32
    %c0_i32_0 = arith.constant 0 : i32
    return %c0_i32 : i32
  }
  func.func @transform_1(%arg0: i32, %arg1: i32) -> (i32, i32) {
    %c0_i32 = arith.constant 0 : i32
    %c0_i32_0 = arith.constant 0 : i32
    return %arg0, %c0_i32 : i32, i32
  }
  func.func @transform_2(%arg0: i32, %arg1: i32) -> (i32, i32) {
    %c0_i32 = arith.constant 0 : i32
    %c0_i32_0 = arith.constant 0 : i32
    %c0_i32_1 = arith.constant 0 : i32
    return %c0_i32, %c0_i32_0 : i32, i32
  }
  func.func @transform_3(%arg0: i32, %arg1: i32) -> (i32, i32) {
    %c0_i32 = arith.constant 0 : i32
    %c0_i32_0 = arith.constant 0 : i32
    %c0_i32_1 = arith.constant 0 : i32
    return %c0_i32, %c0_i32_0 : i32, i32
  }
  func.func @transform_4(%arg0: i32, %arg1: i32) -> (i32, i32) {
    %c0_i32 = arith.constant 0 : i32
    %c0_i32_0 = arith.constant 0 : i32
    %c0_i32_1 = arith.constant 0 : i32
    return %c0_i32, %c0_i32_0 : i32, i32
  }
  func.func @transform_5(%arg0: i32, %arg1: i32) -> (i32, i32, i32) {
    %c0_i32 = arith.constant 0 : i32
    %c0_i32_0 = arith.constant 0 : i32
    return %arg1, %arg0, %c0_i32 : i32, i32, i32
  }
  func.func @transform_6(%arg0: i32, %arg1: i32) -> (i32, i32, i32) {
    %c0_i32 = arith.constant 0 : i32
    %c0_i32_0 = arith.constant 0 : i32
    return %arg1, %arg0, %c0_i32 : i32, i32, i32
  }
}

</mosaic_0001>

<bundles_post_ra>
// kernel: reservoir_rollout.1
= control target key start
LH: loop header
LB: loop body
LE: loop exit
PB: predicated region body
PF: predicated region fallthrough
CT: control target
= control target key end

     0   :  { %12 = vsyncpa [#allocation5], 0  ;;  %s2737_s0 = inlined_call_operand.<no memory space> [shape: f32[1], index: 0, kind: input, shape index: {}]   ;;  %s2738_s1 = inlined_call_operand.vmem [shape: f32[8,128], index: 1, kind: input, shape index: {}]   ;;  %s2739_s2 = inlined_call_operand.hbm [shape: f32[16,128], index: 2, kind: input, shape index: {}]   ;;  %s2740_s3 = inlined_call_operand.vmem [shape: f32[1,128], index: 3, kind: input, shape index: {}]   ;;  %s2741_s4 = inlined_call_operand.hbm [shape: f32[128,128], index: 4, kind: input, shape index: {}]   ;;  %s2742_s5 = inlined_call_operand.hbm [shape: f32[8,8,16], index: 5, kind: input, shape index: {}]   ;;  %s2743_s6 = inlined_call_operand.hbm [shape: f32[8,8,128], index: 6, kind: output, shape index: {}]  }
   0x1   :  { %13 = vsyncpa [#allocation8], 0 }
   0x2   :  { %14 = vsyncpa [#allocation6], 0  ;;  %s2382_s21 = smov [#allocation7]   ;;  %s2383_s23 = smov [#allocation4]  }
   0x3   :  { %s38_s22 = sshll.u32 %s2382_s21, 4  ;;  %s24_s24 = sshll.u32 %s2383_s23, 4  ;;  %s39_s22 = int_to_ptr.vmem [resolvable:$true] %s38_s22  ;;  %s2426_s24 = int_to_ptr.vmem [resolvable:$true] %s24_s24 }
   0x4   :  { %s2288_s27 = scalar_lea.hbm %s2741_s4, 2048 }
   0x5   :  { %p2289_p0 = scmp.ne.s32.totalorder %s2741_s4, %s2288_s27  ;;  %p2292_p1 = scmp.lt.u32.totalorder %s2288_s27, %s2741_s4 }
   0x7   :  { %p2294_p2 = pnand %p2292_p1, %p2289_p0 }
   0x9   :  { %2297 = shalt.err (!%p2294_p2)
}
   0xa   :  { %s2298_s8 = scalar_lea.vmem %s39_s22, 2048  ;;  %p2303_p4 = scmp.lt.s32.totalorder %s39_s22, %s39_s22 }
   0xb   :  { %p2299_p3 = scmp.ne.s32.totalorder %s39_s22, %s2298_s8  ;;  %p2304_p5 = scmp.lt.s32.totalorder %s2298_s8, %s2298_s8 }
   0xd   :  { %p2305_p6 = por %p2304_p5, %p2303_p4 }
   0xf   :  { %p2306_p7 = pnand %p2305_p6, %p2299_p3 }
  0x11   :  { %2309 = shalt.err (!%p2306_p7)
}
  0x12   :  { %s2384_s9 = smov 128   ;;  %s2385_s10 = smov 8  }
  0x13   :  { %44 = dma.hbm_to_vmem [thread:$0]  %s2741_s4, 2048, %s39_s22, [#allocation8], %s2384_s9, %s2384_s9, %s2385_s10  }
  0x14   :  { %s2310_s15 = scalar_lea.hbm %s2739_s2, 256 }
  0x15   :  { %p2311_p8 = scmp.ne.s32.totalorder %s2739_s2, %s2310_s15  ;;  %p2314_p9 = scmp.lt.u32.totalorder %s2310_s15, %s2739_s2 }
  0x17   :  { %p2316_p10 = pnand %p2314_p9, %p2311_p8 }
  0x19   :  { %2319 = shalt.err (!%p2316_p10)
}
  0x1a   :  { %s2320_s20 = scalar_lea.vmem %s2426_s24, 256  ;;  %p2325_p12 = scmp.lt.s32.totalorder %s2426_s24, %s2426_s24 }
  0x1b   :  { %p2321_p11 = scmp.ne.s32.totalorder %s2426_s24, %s2320_s20  ;;  %p2326_p13 = scmp.lt.s32.totalorder %s2320_s20, %s2320_s20 }
  0x1d   :  { %p2327_p0 = por %p2326_p13, %p2325_p12 }
  0x1f   :  { %p2328_p1 = pnand %p2327_p0, %p2321_p11 }
  0x21   :  { %2331 = shalt.err (!%p2328_p1)
}
  0x22   :  { %30 = dma.hbm_to_vmem [thread:$0]  %s2739_s2, 256, %s2426_s24, [#allocation5], %s2384_s9, %s2384_s9, %s2385_s10  }
  0x23   :  { %s2386_s22 = smov [#allocation9]   ;;  %s2332_s27 = scalar_lea.hbm %s2742_s5, 1024 }
  0x24   :  { %s50_s23 = sshll.u32 %s2386_s22, 4  ;;  %p2333_p2 = scmp.ne.s32.totalorder %s2742_s5, %s2332_s27  ;;  %s51_s23 = int_to_ptr.vmem [resolvable:$true] %s50_s23 }
  0x25   :  { %p2336_p3 = scmp.lt.u32.totalorder %s2332_s27, %s2742_s5 }
  0x27   :  { %p2338_p4 = pnand %p2336_p3, %p2333_p2 }
  0x29   :  { %2341 = shalt.err (!%p2338_p4)
}
  0x2a   :  { %s2342_s8 = scalar_lea.vmem %s51_s23, 1024  ;;  %p2347_p6 = scmp.lt.s32.totalorder %s51_s23, %s51_s23 }
  0x2b   :  { %p2343_p5 = scmp.ne.s32.totalorder %s51_s23, %s2342_s8  ;;  %p2348_p7 = scmp.lt.s32.totalorder %s2342_s8, %s2342_s8 }
  0x2d   :  { %p2349_p8 = por %p2348_p7, %p2347_p6 }
  0x2f   :  { %p2350_p9 = pnand %p2349_p8, %p2343_p5 }
  0x31   :  { %2353 = shalt.err (!%p2350_p9)
}
  0x32   :  { %56 = dma.hbm_to_vmem [thread:$0]  %s2742_s5, 1024, %s51_s23, [#allocation8], %s2384_s9, %s2384_s9, %s2385_s10  }
  0x33   :  { %2376 = dma.done.wait [#allocation5], 256  }
  0x34   :  { %2377 = vsyncadd [#allocation5], 4294967040 }
  0x35   :  { %2378 = dma.done.wait [#allocation8], 3072  }
  0x36   :  { %2379 = vsyncadd [#allocation8], 4294964224  ;;  %v2387_v0 = vmov 0.0|0.0   ;;  %vm2388_vm0 = vmmov 0   ;;  %v2389_v1 = vmov 0.0   ;;  %v75_v2 = vld [vmem:[#allocation4] sm:$0xff]  ;;  %v2584_v38 = vstv %s2737_s0 }
  0x37   :  { %2023 = vmatprep.subr.bf16.mxu0 %v2387_v0  ;;  %1691 = vmatprep.mubr.msk.f32.mxu0 %vm2388_vm0, %v2389_v1  ;;  %v76_v3 = vld [vmem:[#allocation4 + $0x8] sm:$0xff]  ;;  %v158_v5 = vld [vmem:[#allocation7] sm:$0xff]  ;;  %v159_v6 = vld [vmem:[#allocation7 + $0x8] sm:$0xff]  ;;  %vm84_vm1 = vcmask 130048   ;;  %s246_s15 = ssub.f32 1.0, %s2737_s0  ;;  %s2390_s0 = smov [#allocation10]  }
  0x38   :  { %2050 = vmatprep.subr.bf16.mxu1 %v2387_v0  ;;  %1733 = vmatprep.mubr.msk.f32.mxu1 %vm2388_vm0, %v2389_v1  ;;  %v2484_v4 = vpack.c.bf16 %v76_v3, %v75_v2  ;;  %v74_v7 = vld [vmem:[#allocation9] sm:$0xff]  ;;  %v2487_v8 = vpack.c.bf16 %v159_v6, %v158_v5  ;;  %v160_v9 = vld [vmem:[#allocation7 + $0x10] sm:$0xff]  ;;  %v161_v10 = vld [vmem:[#allocation7 + $0x18] sm:$0xff] }
  0x39   :  { %v254_v11 = vld [vmem:[#allocation9 + $0x8] sm:$0xff]  ;;  %v2494_v12 = vpack.c.bf16 %v161_v10, %v160_v9  ;;  %v162_v13 = vld [vmem:[#allocation7 + $0x20] sm:$0xff]  ;;  %v164_v16 = vld [vmem:[#allocation7 + $0x30] sm:$0xff]  ;;  %v2579_v37 = vstv %s246_s15 }
  0x3a   :  { %2025 = vmatpush3.bf16.msra.mxu0 %v2484_v4  ;;  %2052 = vmatpush3.bf16.msra.mxu1 %v2484_v4  ;;  %v163_v14 = vld [vmem:[#allocation7 + $0x28] sm:$0xff]  ;;  %v165_v17 = vld [vmem:[#allocation7 + $0x38] sm:$0xff]  ;;  %v166_v19 = vld [vmem:[#allocation7 + $0x40] sm:$0xff] }
  0x3b   :  { %2026 = vmatprep.subr.bf16.mxu0 %v2387_v0  ;;  %2053 = vmatprep.subr.bf16.mxu1 %v2387_v0  ;;  %v2505_v15 = vpack.c.bf16 %v163_v14, %v162_v13  ;;  %v2511_v18 = vpack.c.bf16 %v165_v17, %v164_v16  ;;  %v167_v20 = vld [vmem:[#allocation7 + $0x48] sm:$0xff]  ;;  %v168_v22 = vld [vmem:[#allocation7 + $0x50] sm:$0xff]  ;;  %v169_v23 = vld [vmem:[#allocation7 + $0x58] sm:$0xff] }
  0x3c   :  { %v2517_v21 = vpack.c.bf16 %v167_v20, %v166_v19  ;;  %v2523_v24 = vpack.c.bf16 %v169_v23, %v168_v22  ;;  %v170_v25 = vld [vmem:[#allocation7 + $0x60] sm:$0xff]  ;;  %v171_v26 = vld [vmem:[#allocation7 + $0x68] sm:$0xff]  ;;  %v172_v28 = vld [vmem:[#allocation7 + $0x70] sm:$0xff] }
  0x3d   :  { %1692 = vmatmul.mubr.msk.f32.vlgmr.msra.gmra.mrb[0].mxu0 %vm84_vm1, %v74_v7  ;;  %1734 = vmatmul.mubr.msk.f32.vlgmr.msra.gmra.mrb[0].mxu1 %vm84_vm1, %v254_v11  ;;  %v2529_v27 = vpack.c.bf16 %v171_v26, %v170_v25  ;;  %v173_v29 = vld [vmem:[#allocation7 + $0x78] sm:$0xff]  ;;  %v70_v31 = vld [vmem:[%s2738_s1] sm:$0xff]  ;;  %v785_v51 = vld [vmem:[#allocation9 + $0x20] sm:$0xff] }
  0x3e   :  { %2028 = vmatpush3.bf16.msra.mxu0 %v2487_v8  ;;  %1726 = vmatprep.mubr.msk.f32.mxu0 %vm2388_vm0, %v2389_v1  ;;  %v2535_v30 = vpack.c.bf16 %v173_v29, %v172_v28  ;;  %v431_v32 = vld [vmem:[#allocation9 + $0x10] sm:$0xff]  ;;  %v248_v39 = vmul.f32 %v2579_v37, %v70_v31  ;;  %v608_v43 = vld [vmem:[#allocation9 + $0x18] sm:$0xff]  ;;  %v962_v59 = vld [vmem:[#allocation9 + $0x28] sm:$0xff] }
  0x3f   :  { %2029 = vmatprep.subr.bf16.mxu0 %v2387_v0  ;;  %2055 = vmatpush3.bf16.msra.mxu1 %v2487_v8  ;;  %v2573_v33 = vld [vmem:[%s2740_s3] ss:$0 sm:$0xff]  ;;  %v1316_v17 = vld [vmem:[#allocation9 + $0x38] sm:$0xff]  ;;  %s1498_s3 = sshll.u32 %s2390_s0, 4  ;;  %s1499_s3 = int_to_ptr.vmem [resolvable:$true] %s1498_s3 }
  0x40   :  { %1768 = vmatprep.mubr.msk.f32.mxu1 %vm2388_vm0, %v2389_v1  ;;  %2056 = vmatprep.subr.bf16.mxu1 %v2387_v0  ;;  %v1139_v6 = vld [vmem:[#allocation9 + $0x30] sm:$0xff]  ;;  %s2354_s18 = scalar_lea.vmem %s1499_s3, 1024  ;;  %p2359_p11 = scmp.lt.s32.totalorder %s1499_s3, %s1499_s3 }
  0x41   :  { %p2355_p10 = scmp.ne.s32.totalorder %s1499_s3, %s2354_s18  ;;  %p2360_p12 = scmp.lt.s32.totalorder %s2354_s18, %s2354_s18 }
  0x42   :  { %2031 = vmatpush3.bf16.msra.mxu0 %v2494_v12 }
  0x43   :  { %2032 = vmatprep.subr.bf16.mxu0 %v2387_v0  ;;  %2058 = vmatpush3.bf16.msra.mxu1 %v2494_v12  ;;  %p2361_p13 = por %p2360_p12, %p2359_p11 }
  0x44   :  { %2059 = vmatprep.subr.bf16.mxu1 %v2387_v0 }
  0x45   :  { %p2362_p0 = pnand %p2361_p13, %p2355_p10 }
  0x46   :  { %2034 = vmatpush3.bf16.msra.mxu0 %v2505_v15 }
  0x47   :  { %2035 = vmatprep.subr.bf16.mxu0 %v2387_v0  ;;  %2061 = vmatpush3.bf16.msra.mxu1 %v2505_v15 }
  0x48   :  { %2062 = vmatprep.subr.bf16.mxu1 %v2387_v0 }
  0x4a   :  { %2037 = vmatpush3.bf16.msra.mxu0 %v2511_v18 }
  0x4b   :  { %2038 = vmatprep.subr.bf16.mxu0 %v2387_v0  ;;  %2064 = vmatpush3.bf16.msra.mxu1 %v2511_v18 }
  0x4c   :  { %2065 = vmatprep.subr.bf16.mxu1 %v2387_v0 }
  0x4e   :  { %2040 = vmatpush3.bf16.msra.mxu0 %v2517_v21 }
  0x4f   :  { %2041 = vmatprep.subr.bf16.mxu0 %v2387_v0  ;;  %2067 = vmatpush3.bf16.msra.mxu1 %v2517_v21 }
  0x50   :  { %2068 = vmatprep.subr.bf16.mxu1 %v2387_v0 }
  0x52   :  { %2043 = vmatpush3.bf16.msra.mxu0 %v2523_v24 }
  0x53   :  { %2044 = vmatprep.subr.bf16.mxu0 %v2387_v0  ;;  %2070 = vmatpush3.bf16.msra.mxu1 %v2523_v24 }
  0x54   :  { %2071 = vmatprep.subr.bf16.mxu1 %v2387_v0 }
  0x56   :  { %2046 = vmatpush3.bf16.msra.mxu0 %v2529_v27 }
  0x57   :  { %2047 = vmatprep.subr.bf16.mxu0 %v2387_v0  ;;  %2073 = vmatpush3.bf16.msra.mxu1 %v2529_v27 }
  0x58   :  { %2074 = vmatprep.subr.bf16.mxu1 %v2387_v0 }
  0x5a   :  { %2049 = vmatpush3.bf16.msra.mxu0 %v2535_v30 }
  0x5b   :  { %2077 = vmatprep.subr.bf16.mxu0 %v2387_v0  ;;  %2076 = vmatpush3.bf16.msra.mxu1 %v2535_v30 }
  0x5c   :  { %2104 = vmatprep.subr.bf16.mxu1 %v2387_v0 }
  0x5d   :  { %1727 = vmatmul.mubr.f32.vlgmr.msra.gmra.mrb[0].mxu0 %v70_v31 }
  0x5e   :  { %2079 = vmatpush3.bf16.msra.mxu0 %v2484_v4  ;;  %1775 = vmatprep.mubr.msk.f32.mxu0 %vm2388_vm0, %v2389_v1 }
  0x5f   :  { %2080 = vmatprep.subr.bf16.mxu0 %v2387_v0 }
  0x61   :  { %1776 = vmatmul.mubr.msk.f32.vlgmr.msra.gmra.mrb[2].mxu0 %vm84_vm1, %v431_v32 }
  0x62   :  { %2082 = vmatpush3.bf16.msra.mxu0 %v2487_v8  ;;  %1810 = vmatprep.mubr.msk.f32.mxu0 %vm2388_vm0, %v2389_v1 }
  0x63   :  { %2083 = vmatprep.subr.bf16.mxu0 %v2387_v0 }
  0x66   :  { %2085 = vmatpush3.bf16.msra.mxu0 %v2494_v12 }
  0x67   :  { %2086 = vmatprep.subr.bf16.mxu0 %v2387_v0 }
  0x6a   :  { %2088 = vmatpush3.bf16.msra.mxu0 %v2505_v15 }
  0x6b   :  { %2089 = vmatprep.subr.bf16.mxu0 %v2387_v0 }
  0x6e   :  { %2091 = vmatpush3.bf16.msra.mxu0 %v2511_v18 }
  0x6f   :  { %2092 = vmatprep.subr.bf16.mxu0 %v2387_v0 }
  0x72   :  { %2094 = vmatpush3.bf16.msra.mxu0 %v2517_v21 }
  0x73   :  { %2095 = vmatprep.subr.bf16.mxu0 %v2387_v0 }
  0x76   :  { %2097 = vmatpush3.bf16.msra.mxu0 %v2523_v24 }
  0x77   :  { %2098 = vmatprep.subr.bf16.mxu0 %v2387_v0 }
  0x7a   :  { %2100 = vmatpush3.bf16.msra.mxu0 %v2529_v27 }
  0x7b   :  { %2101 = vmatprep.subr.bf16.mxu0 %v2387_v0 }
  0x7e   :  { %2103 = vmatpush3.bf16.msra.mxu0 %v2535_v30 }
  0x7f   :  { %2131 = vmatprep.subr.bf16.mxu0 %v2387_v0 }
 0x130   :  { %v240_v34 = vpop.f32.mrb[0].mxu0 }
 0x131   :  { %v2239_v35 = vadd.f32 %v2573_v33, %v240_v34  ;;  %v1728_v36 = vpop.f32.mrb[1].mxu0 }
 0x133   :  { %2272 = vtanh.f32 %v2239_v35 }
 0x13d   :  { %v2273_v40 = vpop.eup %2272 }
 0x13e   :  { %v250_v41 = vmul.f32 %v2273_v40, %v2584_v38 }
 0x140   :  { %v251_v42 = vadd.f32 %v250_v41, %v248_v39 }
 0x142   :  { %252 = vst [vmem:[#allocation10] sm:$0xff] %v251_v42  ;;  %1769 = vmatmul.mubr.f32.vlgmr.msra.gmra.mrb[0].mxu1 %v251_v42  ;;  %v425_v48 = vmul.f32 %v251_v42, %v2579_v37 }
 0x143   :  { %2106 = vmatpush3.bf16.msra.mxu1 %v2484_v4  ;;  %1817 = vmatprep.mubr.msk.f32.mxu1 %vm2388_vm0, %v2389_v1 }
 0x144   :  { %2107 = vmatprep.subr.bf16.mxu1 %v2387_v0 }
 0x146   :  { %1818 = vmatmul.mubr.msk.f32.vlgmr.msra.gmra.mrb[2].mxu1 %vm84_vm1, %v608_v43 }
 0x147   :  { %2109 = vmatpush3.bf16.msra.mxu1 %v2487_v8  ;;  %1852 = vmatprep.mubr.msk.f32.mxu1 %vm2388_vm0, %v2389_v1 }
 0x148   :  { %2110 = vmatprep.subr.bf16.mxu1 %v2387_v0 }
 0x14b   :  { %2112 = vmatpush3.bf16.msra.mxu1 %v2494_v12 }
 0x14c   :  { %2113 = vmatprep.subr.bf16.mxu1 %v2387_v0 }
 0x14f   :  { %2115 = vmatpush3.bf16.msra.mxu1 %v2505_v15 }
 0x150   :  { %2116 = vmatprep.subr.bf16.mxu1 %v2387_v0 }
 0x153   :  { %2118 = vmatpush3.bf16.msra.mxu1 %v2511_v18 }
 0x154   :  { %2119 = vmatprep.subr.bf16.mxu1 %v2387_v0 }
 0x157   :  { %2121 = vmatpush3.bf16.msra.mxu1 %v2517_v21 }
 0x158   :  { %2122 = vmatprep.subr.bf16.mxu1 %v2387_v0 }
 0x15b   :  { %2124 = vmatpush3.bf16.msra.mxu1 %v2523_v24 }
 0x15c   :  { %2125 = vmatprep.subr.bf16.mxu1 %v2387_v0 }
 0x15f   :  { %2127 = vmatpush3.bf16.msra.mxu1 %v2529_v27 }
 0x160   :  { %2128 = vmatprep.subr.bf16.mxu1 %v2387_v0 }
 0x163   :  { %2130 = vmatpush3.bf16.msra.mxu1 %v2535_v30 }
 0x164   :  { %2158 = vmatprep.subr.bf16.mxu1 %v2387_v0 }
 0x215   :  { %v419_v44 = vpop.f32.mrb[0].mxu1 }
 0x216   :  { %v2240_v45 = vadd.f32 %v2573_v33, %v419_v44  ;;  %v1770_v46 = vpop.f32.mrb[1].mxu1 }
 0x218   :  { %2274 = vtanh.f32 %v2240_v45 }
 0x222   :  { %v2275_v47 = vpop.eup %2274 }
 0x223   :  { %v426_v49 = vmul.f32 %v2275_v47, %v2584_v38 }
 0x225   :  { %v427_v50 = vadd.f32 %v426_v49, %v425_v48 }
 0x227   :  { %429 = vst [vmem:[#allocation10 + $0x8] sm:$0xff] %v427_v50  ;;  %1811 = vmatmul.mubr.f32.vlgmr.msra.gmra.mrb[2].mxu0 %v427_v50  ;;  %v602_v56 = vmul.f32 %v427_v50, %v2579_v37 }
 0x228   :  { %2133 = vmatpush3.bf16.msra.mxu0 %v2484_v4  ;;  %1859 = vmatprep.mubr.msk.f32.mxu0 %vm2388_vm0, %v2389_v1 }
 0x229   :  { %2134 = vmatprep.subr.bf16.mxu0 %v2387_v0 }
 0x22b   :  { %1860 = vmatmul.mubr.msk.f32.vlgmr.msra.gmra.mrb[4].mxu0 %vm84_vm1, %v785_v51 }
 0x22c   :  { %2136 = vmatpush3.bf16.msra.mxu0 %v2487_v8  ;;  %1894 = vmatprep.mubr.msk.f32.mxu0 %vm2388_vm0, %v2389_v1 }
 0x22d   :  { %2137 = vmatprep.subr.bf16.mxu0 %v2387_v0 }
 0x230   :  { %2139 = vmatpush3.bf16.msra.mxu0 %v2494_v12 }
 0x231   :  { %2140 = vmatprep.subr.bf16.mxu0 %v2387_v0 }
 0x234   :  { %2142 = vmatpush3.bf16.msra.mxu0 %v2505_v15 }
 0x235   :  { %2143 = vmatprep.subr.bf16.mxu0 %v2387_v0 }
 0x238   :  { %2145 = vmatpush3.bf16.msra.mxu0 %v2511_v18 }
 0x239   :  { %2146 = vmatprep.subr.bf16.mxu0 %v2387_v0 }
 0x23c   :  { %2148 = vmatpush3.bf16.msra.mxu0 %v2517_v21 }
 0x23d   :  { %2149 = vmatprep.subr.bf16.mxu0 %v2387_v0 }
 0x240   :  { %2151 = vmatpush3.bf16.msra.mxu0 %v2523_v24 }
 0x241   :  { %2152 = vmatprep.subr.bf16.mxu0 %v2387_v0 }
 0x244   :  { %2154 = vmatpush3.bf16.msra.mxu0 %v2529_v27 }
 0x245   :  { %2155 = vmatprep.subr.bf16.mxu0 %v2387_v0 }
 0x248   :  { %2157 = vmatpush3.bf16.msra.mxu0 %v2535_v30 }
 0x249   :  { %2185 = vmatprep.subr.bf16.mxu0 %v2387_v0 }
 0x2fa   :  { %v596_v52 = vpop.f32.mrb[2].mxu0 }
 0x2fb   :  { %v2241_v53 = vadd.f32 %v2573_v33, %v596_v52  ;;  %v1812_v54 = vpop.f32.mrb[3].mxu0 }
 0x2fd   :  { %2276 = vtanh.f32 %v2241_v53 }
 0x307   :  { %v2277_v55 = vpop.eup %2276 }
 0x308   :  { %v603_v57 = vmul.f32 %v2277_v55, %v2584_v38 }
 0x30a   :  { %v604_v58 = vadd.f32 %v603_v57, %v602_v56 }
 0x30c   :  { %606 = vst [vmem:[#allocation10 + $0x10] sm:$0xff] %v604_v58  ;;  %1853 = vmatmul.mubr.f32.vlgmr.msra.gmra.mrb[2].mxu1 %v604_v58  ;;  %v779_v2 = vmul.f32 %v604_v58, %v2579_v37 }
 0x30d   :  { %2160 = vmatpush3.bf16.msra.mxu1 %v2484_v4  ;;  %1901 = vmatprep.mubr.msk.f32.mxu1 %vm2388_vm0, %v2389_v1 }
 0x30e   :  { %2161 = vmatprep.subr.bf16.mxu1 %v2387_v0 }
 0x310   :  { %1902 = vmatmul.mubr.msk.f32.vlgmr.msra.gmra.mrb[4].mxu1 %vm84_vm1, %v962_v59 }
 0x311   :  { %2163 = vmatpush3.bf16.msra.mxu1 %v2487_v8  ;;  %1936 = vmatprep.mubr.msk.f32.mxu1 %vm2388_vm0, %v2389_v1 }
 0x312   :  { %2164 = vmatprep.subr.bf16.mxu1 %v2387_v0 }
 0x315   :  { %2166 = vmatpush3.bf16.msra.mxu1 %v2494_v12 }
 0x316   :  { %2167 = vmatprep.subr.bf16.mxu1 %v2387_v0 }
 0x319   :  { %2169 = vmatpush3.bf16.msra.mxu1 %v2505_v15 }
 0x31a   :  { %2170 = vmatprep.subr.bf16.mxu1 %v2387_v0 }
 0x31d   :  { %2172 = vmatpush3.bf16.msra.mxu1 %v2511_v18 }
 0x31e   :  { %2173 = vmatprep.subr.bf16.mxu1 %v2387_v0 }
 0x321   :  { %2175 = vmatpush3.bf16.msra.mxu1 %v2517_v21 }
 0x322   :  { %2176 = vmatprep.subr.bf16.mxu1 %v2387_v0 }
 0x325   :  { %2178 = vmatpush3.bf16.msra.mxu1 %v2523_v24 }
 0x326   :  { %2179 = vmatprep.subr.bf16.mxu1 %v2387_v0 }
 0x329   :  { %2181 = vmatpush3.bf16.msra.mxu1 %v2529_v27 }
 0x32a   :  { %2182 = vmatprep.subr.bf16.mxu1 %v2387_v0 }
 0x32d   :  { %2184 = vmatpush3.bf16.msra.mxu1 %v2535_v30 }
 0x32e   :  { %2212 = vmatprep.subr.bf16.mxu1 %v2387_v0 }
 0x3df   :  { %v773_v60 = vpop.f32.mrb[2].mxu1 }
 0x3e0   :  { %v2242_v61 = vadd.f32 %v2573_v33, %v773_v60  ;;  %v1854_v62 = vpop.f32.mrb[3].mxu1 }
 0x3e2   :  { %2278 = vtanh.f32 %v2242_v61 }
 0x3ec   :  { %v2279_v63 = vpop.eup %2278 }
 0x3ed   :  { %v780_v3 = vmul.f32 %v2279_v63, %v2584_v38 }
 0x3ef   :  { %v781_v5 = vadd.f32 %v780_v3, %v779_v2 }
 0x3f1   :  { %783 = vst [vmem:[#allocation10 + $0x18] sm:$0xff] %v781_v5  ;;  %1895 = vmatmul.mubr.f32.vlgmr.msra.gmra.mrb[4].mxu0 %v781_v5  ;;  %v956_v13 = vmul.f32 %v781_v5, %v2579_v37 }
 0x3f2   :  { %2187 = vmatpush3.bf16.msra.mxu0 %v2484_v4  ;;  %1943 = vmatprep.mubr.msk.f32.mxu0 %vm2388_vm0, %v2389_v1 }
 0x3f3   :  { %2188 = vmatprep.subr.bf16.mxu0 %v2387_v0 }
 0x3f5   :  { %1944 = vmatmul.mubr.msk.f32.vlgmr.msra.gmra.mrb[6].mxu0 %vm84_vm1, %v1139_v6 }
 0x3f6   :  { %2190 = vmatpush3.bf16.msra.mxu0 %v2487_v8  ;;  %1978 = vmatprep.mubr.msk.f32.mxu0 %vm2388_vm0, %v2389_v1 }
 0x3f7   :  { %2191 = vmatprep.subr.bf16.mxu0 %v2387_v0 }
 0x3fa   :  { %2193 = vmatpush3.bf16.msra.mxu0 %v2494_v12 }
 0x3fb   :  { %2194 = vmatprep.subr.bf16.mxu0 %v2387_v0 }
 0x3fe   :  { %2196 = vmatpush3.bf16.msra.mxu0 %v2505_v15 }
 0x3ff   :  { %2197 = vmatprep.subr.bf16.mxu0 %v2387_v0 }
 0x402   :  { %2199 = vmatpush3.bf16.msra.mxu0 %v2511_v18 }
 0x403   :  { %2200 = vmatprep.subr.bf16.mxu0 %v2387_v0 }
 0x406   :  { %2202 = vmatpush3.bf16.msra.mxu0 %v2517_v21 }
 0x407   :  { %2203 = vmatprep.subr.bf16.mxu0 %v2387_v0 }
 0x40a   :  { %2205 = vmatpush3.bf16.msra.mxu0 %v2523_v24 }
 0x40b   :  { %2206 = vmatprep.subr.bf16.mxu0 %v2387_v0 }
 0x40e   :  { %2208 = vmatpush3.bf16.msra.mxu0 %v2529_v27 }
 0x40f   :  { %2209 = vmatprep.subr.bf16.mxu0 %v2387_v0 }
 0x412   :  { %2211 = vmatpush3.bf16.msra.mxu0 %v2535_v30 }
 0x4c4   :  { %v950_v7 = vpop.f32.mrb[4].mxu0 }
 0x4c5   :  { %v2243_v9 = vadd.f32 %v2573_v33, %v950_v7  ;;  %v1896_v10 = vpop.f32.mrb[5].mxu0 }
 0x4c7   :  { %2280 = vtanh.f32 %v2243_v9 }
 0x4d1   :  { %v2281_v11 = vpop.eup %2280 }
 0x4d2   :  { %v957_v14 = vmul.f32 %v2281_v11, %v2584_v38 }
 0x4d4   :  { %v958_v16 = vadd.f32 %v957_v14, %v956_v13 }
 0x4d6   :  { %960 = vst [vmem:[#allocation10 + $0x20] sm:$0xff] %v958_v16  ;;  %1937 = vmatmul.mubr.f32.vlgmr.msra.gmra.mrb[4].mxu1 %v958_v16 }
 0x4d7   :  { %2214 = vmatpush3.bf16.msra.mxu1 %v2484_v4  ;;  %1985 = vmatprep.mubr.msk.f32.mxu1 %vm2388_vm0, %v2389_v1 }
 0x4d8   :  { %2215 = vmatprep.subr.bf16.mxu1 %v2387_v0 }
 0x4da   :  { %1986 = vmatmul.mubr.msk.f32.vlgmr.msra.gmra.mrb[6].mxu1 %vm84_vm1, %v1316_v17 }
 0x4db   :  { %2217 = vmatpush3.bf16.msra.mxu1 %v2487_v8  ;;  %2020 = vmatprep.mubr.msk.f32.mxu1 %vm2388_vm0, %v2389_v1 }
 0x4dc   :  { %2218 = vmatprep.subr.bf16.mxu1 %v2387_v0 }
 0x4df   :  { %2220 = vmatpush3.bf16.msra.mxu1 %v2494_v12 }
 0x4e0   :  { %2221 = vmatprep.subr.bf16.mxu1 %v2387_v0 }
 0x4e3   :  { %2223 = vmatpush3.bf16.msra.mxu1 %v2505_v15  ;;  %v1133_v15 = vmul.f32 %v958_v16, %v2579_v37 }
 0x4e4   :  { %2224 = vmatprep.subr.bf16.mxu1 %v2387_v0 }
 0x4e7   :  { %2226 = vmatpush3.bf16.msra.mxu1 %v2511_v18 }
 0x4e8   :  { %2227 = vmatprep.subr.bf16.mxu1 %v2387_v0 }
 0x4eb   :  { %2229 = vmatpush3.bf16.msra.mxu1 %v2517_v21 }
 0x4ec   :  { %2230 = vmatprep.subr.bf16.mxu1 %v2387_v0 }
 0x4ef   :  { %2232 = vmatpush3.bf16.msra.mxu1 %v2523_v24 }
 0x4f0   :  { %2233 = vmatprep.subr.bf16.mxu1 %v2387_v0 }
 0x4f3   :  { %2235 = vmatpush3.bf16.msra.mxu1 %v2529_v27 }
 0x4f4   :  { %2236 = vmatprep.subr.bf16.mxu1 %v2387_v0 }
 0x4f7   :  { %2238 = vmatpush3.bf16.msra.mxu1 %v2535_v30 }
 0x5a9   :  { %v1127_v1 = vpop.f32.mrb[4].mxu1 }
 0x5aa   :  { %v2244_v4 = vadd.f32 %v2573_v33, %v1127_v1  ;;  %v1938_v8 = vpop.f32.mrb[5].mxu1 }
 0x5ac   :  { %2282 = vtanh.f32 %v2244_v4 }
 0x5b6   :  { %v2283_v12 = vpop.eup %2282 }
 0x5b7   :  { %v1134_v18 = vmul.f32 %v2283_v12, %v2584_v38 }
 0x5b9   :  { %v1135_v19 = vadd.f32 %v1134_v18, %v1133_v15 }
 0x5bb   :  { %1137 = vst [vmem:[#allocation10 + $0x28] sm:$0xff] %v1135_v19  ;;  %1979 = vmatmul.mubr.f32.vlgmr.msra.gmra.mrb[6].mxu0 %v1135_v19  ;;  %v1310_v23 = vmul.f32 %v1135_v19, %v2579_v37 }
 0x68e   :  { %v1304_v20 = vpop.f32.mrb[6].mxu0 }
 0x68f   :  { %v2245_v21 = vadd.f32 %v2573_v33, %v1304_v20  ;;  %v1980_v22 = vpop.f32.mrb[7].mxu0 }
 0x691   :  { %2284 = vtanh.f32 %v2245_v21 }
 0x69b   :  { %v2285_v0 = vpop.eup %2284 }
 0x69c   :  { %v1311_v24 = vmul.f32 %v2285_v0, %v2584_v38 }
 0x69e   :  { %v1312_v25 = vadd.f32 %v1311_v24, %v1310_v23 }
 0x6a0   :  { %1314 = vst [vmem:[#allocation10 + $0x30] sm:$0xff] %v1312_v25  ;;  %2021 = vmatmul.mubr.f32.vlgmr.msra.gmra.mrb[6].mxu1 %v1312_v25  ;;  %v1487_v30 = vmul.f32 %v1312_v25, %v2579_v37 }
 0x773   :  { %v1481_v26 = vpop.f32.mrb[6].mxu1 }
 0x774   :  { %v2246_v27 = vadd.f32 %v2573_v33, %v1481_v26  ;;  %v2022_v28 = vpop.f32.mrb[7].mxu1 }
 0x776   :  { %2286 = vtanh.f32 %v2246_v27 }
 0x780   :  { %v2287_v29 = vpop.eup %2286 }
 0x781   :  { %v1488_v31 = vmul.f32 %v2287_v29, %v2584_v38 }
 0x783   :  { %v1489_v32 = vadd.f32 %v1488_v31, %v1487_v30 }
 0x785   :  { %1491 = vst [vmem:[#allocation10 + $0x38] sm:$0xff] %v1489_v32 }
 0x786   :  { %2365 = shalt.err (!%p2362_p0)
}
 0x787   :  { %s2366_s4 = scalar_lea.hbm %s2743_s6, 1024 }
 0x788   :  { %p2367_p1 = scmp.ne.s32.totalorder %s2743_s6, %s2366_s4  ;;  %p2370_p2 = scmp.lt.u32.totalorder %s2366_s4, %s2743_s6 }
 0x78a   :  { %p2372_p3 = pnand %p2370_p2, %p2367_p1 }
 0x78c   :  { %2375 = shalt.err (!%p2372_p3)
}
 0x78d   :  { %1504 = dma.vmem_to_hbm [thread:$0]  %s1499_s3, 1024, %s2743_s6, [#allocation6], %s2384_s9, %s2384_s9, %s2385_s10  }
 0x78e   :  { %2380 = dma.done.wait [#allocation6], 1024  }
 0x78f   :  { %2381 = vsyncadd [#allocation6], 4294966272 }
 0x790   :  { %1508 = vsyncpa [#allocation5], 1 }
 0x791   :  { %1509 = vsyncpa [#allocation8], 1 }
 0x792   :  { %1510 = vsyncpa [#allocation6], 1 }

</bundles_post_ra>
